<compile_context>
chip_gen: v5e
topology: v5e:2x2
jax: 0.10.0
libtpu: 0.0.40
codegen_flags: <defaults>
</compile_context>

<pallas_src>
import functools

import jax
import jax.numpy as jnp
from jax import lax
from jax.experimental import pallas as pl
from jax.experimental.pallas import tpu as pltpu


def _linear_forecaster_kernel_t(s_ref, w_ref, ot_ref):
    # s_ref: (TM, in_features), w_ref: (No, in_features) -> ot_ref: (No, TM)
    # Contract on the shared last (lane) axis; weight first so the output tile
    # is lane-dense along the batch axis (unmasked stores).
    ot_ref[...] = lax.dot_general(
        w_ref[...],
        s_ref[...],
        dimension_numbers=(((1,), (1,)), ((), ())),
        preferred_element_type=jnp.float32,
    ).astype(ot_ref.dtype)


@functools.partial(jax.jit, static_argnames=("tm",))
def linear_forecaster_forward(
    s_k: jax.Array, weight: jax.Array, *, tm: int = 8192
) -> jax.Array:
    """Forward pass: o_k = s_k @ weight.T

    s_k:    (batch, in_features)
    weight: (No, in_features)   -- same convention as torch nn.Linear.weight
    returns (batch, No)
    """
    batch, in_features = s_k.shape
    No, in_f2 = weight.shape
    assert in_f2 == in_features, "weight shape mismatch"

    if batch <= tm:
        # --- small / interactive path: one full-array VMEM invocation, no grid ---
        out_t = pl.pallas_call(
            _linear_forecaster_kernel_t,
            out_shape=jax.ShapeDtypeStruct((No, batch), s_k.dtype),
            in_specs=[
                pl.BlockSpec(memory_space=pltpu.MemorySpace.VMEM),
                pl.BlockSpec(memory_space=pltpu.MemorySpace.VMEM),
            ],
            out_specs=pl.BlockSpec(memory_space=pltpu.MemorySpace.VMEM),
        )(s_k, weight)
    else:
        # --- batched path: ragged grid over the M (row) axis only; K and No whole ---
        grid = (pl.cdiv(batch, tm),)
        out_t = pl.pallas_call(
            _linear_forecaster_kernel_t,
            out_shape=jax.ShapeDtypeStruct((No, batch), s_k.dtype),
            grid=grid,
            in_specs=[
                # Activation row tiles stream through the pipeline; the partial
                # last block is padded on read by Pallas (no explicit jnp.pad).
                pl.BlockSpec((tm, in_features), lambda i: (i, 0)),
                # Tiny weight: constant block index -> stays resident in VMEM.
                pl.BlockSpec((No, in_features), lambda i: (0, 0)),
            ],
            # Lane-dense (No, tm) output tile; OOB lanes of the last block are
            # masked automatically because out_shape is exactly (No, batch).
            out_specs=pl.BlockSpec((No, tm), lambda i: (0, i)),
            compiler_params=pltpu.CompilerParams(
                # Row tiles are independent -> shard across v7x's two TensorCores.
                dimension_semantics=("parallel",),
                # ~8.6 MiB needed at tm=8192 (lane-padded); leave headroom but
                # stay within every generation's scoped capability.
                vmem_limit_bytes=32 * 1024 * 1024,
            ),
        )(s_k, weight)

    # Tiny (No, batch) -> (batch, No) transpose in the wrapper.
    return out_t.T


if __name__ == "__main__":
    # Module hyper-parameters (small, consistent with the forward signature).
    Nu, Ns, No = 3, 5, 5
    tds = [-1, -2, -3, -4]
    in_features = (Nu + Ns) * len(tds)  # 32
    dtype = jnp.float32

    key = jax.random.PRNGKey(0)
    k_w, k_s, k_b = jax.random.split(key, 3)

    # Deterministic init matching nn.Linear default: U(-1/sqrt(fan_in), 1/sqrt(fan_in))
    bound = 1.0 / jnp.sqrt(jnp.array(in_features, dtype=dtype))
    weight = jax.random.uniform(
        k_w, (No, in_features), dtype=dtype, minval=-bound, maxval=bound
    )

    # 1) Small / interactive forward (the module's usual use): batch=2.
    batch_small = 2
    s_small = jax.random.normal(k_s, (batch_small, in_features), dtype=dtype)
    o_small = jax.block_until_ready(linear_forecaster_forward(s_small, weight))
    ref_small = s_small @ weight.T
    assert o_small.shape == (batch_small, No)
    assert jnp.allclose(o_small, ref_small, atol=1e-5, rtol=1e-5)

    # 2) Batched forward (many stacked forecast steps/samples): batch=2500.
    #    With the default tm=8192 this takes the single no-grid VMEM path.
    batch_big = 2500
    s_big = jax.random.normal(k_b, (batch_big, in_features), dtype=dtype)
    o_big = jax.block_until_ready(linear_forecaster_forward(s_big, weight))
    ref_big = s_big @ weight.T
    assert o_big.shape == (batch_big, No)
    assert jnp.allclose(o_big, ref_big, atol=1e-5, rtol=1e-5)

    # 3) Same data, forcing the gridded ragged-M path (tm=1024 -> 3 tiles,
    #    last one partial) to exercise the pipelined kernel + masked last block.
    o_grid = jax.block_until_ready(
        linear_forecaster_forward(s_big, weight, tm=1024)
    )
    assert o_grid.shape == (batch_big, No)
    assert jnp.allclose(o_grid, ref_big, atol=1e-5, rtol=1e-5)

    print("KERNEL_OK")
</pallas_src>

<mosaic_0001>
module attributes {stable_mosaic.version = 11 : i64} {
  func.func @_linear_forecaster_kernel_t(%arg0: memref<2x32xf32, #tpu.memory_space<vmem>>, %arg1: memref<5x32xf32, #tpu.memory_space<vmem>>, %arg2: memref<5x2xf32, #tpu.memory_space<vmem>>) attributes {dimension_semantics = [], scalar_prefetch = 0 : i64, scratch_operands = 0 : i64, tpu.core_type = #tpu.core_type<tc>} {
    %c0 = arith.constant 0 : index
    %c0_0 = arith.constant 0 : index
    %0 = vector.load %arg1[%c0, %c0_0] : memref<5x32xf32, #tpu.memory_space<vmem>>, vector<5x32xf32>
    %c0_1 = arith.constant 0 : index
    %c0_2 = arith.constant 0 : index
    %1 = vector.load %arg0[%c0_1, %c0_2] : memref<2x32xf32, #tpu.memory_space<vmem>>, vector<2x32xf32>
    %cst = arith.constant dense<0.000000e+00> : vector<5x2xf32>
    %2 = tpu.matmul %0, %1, %cst {dimension_numbers = #tpu.dot_dimension_numbers<[1], [1], [0], [0], [0, 0, 1, 0], [], []>} : vector<5x32xf32>, vector<2x32xf32>, vector<5x2xf32> -> vector<5x2xf32>
    %c0_3 = arith.constant 0 : index
    %c0_4 = arith.constant 0 : index
    %3 = vector.load %arg2[%c0_3, %c0_4] : memref<5x2xf32, #tpu.memory_space<vmem>>, vector<5x2xf32>
    tpu.vector_store %arg2[%c0_3, %c0_4], %2 {strides = array<i32>} : memref<5x2xf32, #tpu.memory_space<vmem>>, vector<5x2xf32>,
    return
  }
}

</mosaic_0001>

<bundles_post_ra>
// kernel: linear_forecaster_forward.1
= control target key start
LH: loop header
LB: loop body
LE: loop exit
PB: predicated region body
PF: predicated region fallthrough
CT: control target
= control target key end

     0   :  { %7 = vsyncpa [#allocation3], 0  ;;  %s158_s0 = inlined_call_operand.hbm [shape: f32[2,32], index: 0, kind: input, shape index: {}]   ;;  %s159_s1 = inlined_call_operand.hbm [shape: f32[5,32], index: 1, kind: input, shape index: {}]   ;;  %s160_s2 = inlined_call_operand.vmem [shape: f32[5,2], index: 2, kind: output, shape index: {}]  }
   0x1   :  { %s14_s11 = sshll.u32 %s158_s0, 4  ;;  %s15_s11 = int_to_ptr.hbm [resolvable:$true] %s14_s11 }
   0x2   :  { %8 = vsyncpa [#allocation5], 0  ;;  %s132_s12 = smov [#allocation2]   ;;  %s25_s16 = sshll.u32 %s159_s1, 4  ;;  %s26_s16 = int_to_ptr.hbm [resolvable:$true] %s25_s16 }
   0x3   :  { %s16_s13 = sshll.u32 %s132_s12, 4  ;;  %s133_s17 = smov [#allocation4]   ;;  %s17_s13 = int_to_ptr.vmem [resolvable:$true] %s16_s13 }
   0x4   :  { %19 = dma.hbm_to_vmem [thread:$0]  %s15_s11, 32, %s17_s13, [#allocation3]  }
   0x5   :  { %s27_s18 = sshll.u32 %s133_s17, 4  ;;  %s28_s18 = int_to_ptr.vmem [resolvable:$true] %s27_s18 }
   0x6   :  { %30 = dma.hbm_to_vmem [thread:$0]  %s26_s16, 128, %s28_s18, [#allocation5]  }
   0x7   :  { %128 = dma.done.wait [#allocation3], 32  }
   0x8   :  { %129 = vsyncadd [#allocation3], 4294967264 }
   0x9   :  { %130 = dma.done.wait [#allocation5], 128  }
   0xa   :  { %131 = vsyncadd [#allocation5], 4294967168  ;;  %vm41_vm0 = vcmask 261120   ;;  %v40_v0 = vld [vmem:[#allocation2] sm:$0x3]  ;;  %vm68_vm1 = vcmask 12288  }
   0xb   :  { %76 = vmatpush.xpose.msk.msra.mxu0 %vm41_vm0, %v40_v0  ;;  %v39_v1 = vld [vmem:[#allocation4] sm:$0x1f] }
   0xe   :  { %77 = vmatmul.msk.f32.vlgmr.msra.gmra.mxu0 %vm41_vm0, %v39_v1 }
  0x8b   :  { %v65_v2 = vpop.f32.mrf.mxu0 }
  0x8c   :  { %69 = vst.msk [vmem:[%s160_s2] sm:$0x1f] %vm68_vm1, %v65_v2 }
  0x8d   :  { %74 = vsyncpa [#allocation3], 1 }
  0x8e   :  { %75 = vsyncpa [#allocation5], 1 }

</bundles_post_ra>
